<compile_context>
chip_gen: v6e
topology: v6e:2x2x1
jax: 0.10.0
libtpu: 0.0.40
codegen_flags: <defaults>
</compile_context>

<pallas_src>
import jax
import jax.numpy as jnp
from jax.experimental import pallas as pl
from jax.experimental.pallas import tpu as pltpu


def _make_rllstm_kernel(seq, batch_p, hidden):
    """Kernel for static (seq, padded batch Bp, hidden size H)."""
    H = hidden

    def kernel(x_ref, wih_ref, whh_ref, b_ref, wout_ref, bout_ref,
               logits_ref, hn_ref, cn_ref):
        # x_ref    : (S*Bp, D)     time-major, flattened, batch zero-padded
        # wih_ref  : (D, 4H)       packed-gate W_ih^T  [i|f|g|o]
        # whh_ref  : (H, 4H)       packed-gate W_hh^T
        # b_ref    : (1, 4H)       b_ih + b_hh
        # wout_ref : (H, 128)      lane-padded lin_out.weight^T
        # bout_ref : (1, 128)
        # logits_ref : (S*Bp, 128) lane-dense output slab
        # hn_ref, cn_ref : (Bp, H)
        f32 = jnp.float32

        # (1) Hoisted input projection + bias, held entirely in vregs:
        #     (S*Bp, D) @ (D, 4H) -> (64, 128) f32 = 8 vregs.  No scratch,
        #     no per-step sub-tile VMEM reads.
        gx = jnp.dot(x_ref[...], wih_ref[...],
                     preferred_element_type=f32) + b_ref[...]

        # Packed recurrent weights: (32, 128) f32 = 4 vregs -> safe to hold
        # as a value across the unrolled loop.
        whh = whh_ref[...]

        # state=None -> zero initial hidden / cell state (vreg-resident).
        h = jnp.zeros((batch_p, H), f32)
        c = jnp.zeros((batch_p, H), f32)

        hs = []
        # (2) Fully-unrolled recurrence (S small & static).  Only h @ W_hh is
        #     on the serial chain, and it is ONE packed 128-lane MXU pass per
        #     step.  Gate extraction is 32-lane sub-slices on otherwise-idle
        #     VPU/XLU slots.  Padded batch rows are row-independent garbage
        #     that is never read back.
        for t in range(seq):
            gates = gx[t * batch_p:(t + 1) * batch_p, :] + jnp.dot(
                h, whh, preferred_element_type=f32)
            i = jax.nn.sigmoid(gates[:, 0 * H:1 * H])
            f = jax.nn.sigmoid(gates[:, 1 * H:2 * H])
            g = jnp.tanh(gates[:, 2 * H:3 * H])
            o = jax.nn.sigmoid(gates[:, 3 * H:4 * H])
            c = f * c + i * g
            h = o * jnp.tanh(c)
            hs.append(h)

        # One-time (Bp, H) stores; Bp=8 keeps sublanes aligned.
        hn_ref[...] = h
        cn_ref[...] = c

        # (3) Hoisted output projection: stack per-step h in registers (no
        #     hs VMEM scratch / store->load hazard), one matmul, lane-dense
        #     full-tile (S*Bp, 128) unmasked store.
        hs_all = jnp.concatenate(hs, axis=0)                    # (S*Bp, H)
        logits_ref[...] = jnp.dot(hs_all, wout_ref[...],
                                  preferred_element_type=f32) + bout_ref[...]

    return kernel


def rllstm_forward(x_bsd, params):
    """x_bsd: (batch, seq, n_actions*2) f32.  Returns (logits, (h_n, c_n))."""
    B, S, D = x_bsd.shape
    H = params["w_hh"].shape[1]             # torch weight_hh_l0: (4H, H)
    A = params["w_out"].shape[0]            # torch lin_out.weight: (A, H)
    OUT = 128                               # lane-dense output slab width
    Bp = max(8, ((B + 7) // 8) * 8)         # sublane-pad batch
    f32 = jnp.float32

    # --- wrapper-side glue: packed-gate weights ---------------------------
    # torch gate order i|f|g|o along rows of weight_*; transposing gives the
    # packed [i|f|g|o] lane layout directly (4H = 128 for H=32, no lane pad).
    wih_p = params["w_ih"].T.astype(f32)                        # (D, 4H)
    whh_p = params["w_hh"].T.astype(f32)                        # (H, 4H)
    b_p = (params["b_ih"] + params["b_hh"]).reshape(1, 4 * H).astype(f32)
    # Output head lane-padded to 128 so the logits store is a full-lane vst.
    wout_p = jnp.zeros((H, OUT), f32).at[:, :A].set(params["w_out"].T)
    bout_p = jnp.zeros((1, OUT), f32).at[0, :A].set(params["b_out"])

    # time-major, batch padded to Bp (padded rows are zero and never read back)
    x_tm = jnp.transpose(x_bsd, (1, 0, 2))                      # (S, B, D)
    x_tm = jnp.pad(x_tm, ((0, 0), (0, Bp - B), (0, 0)))
    x_flat = x_tm.reshape(S * Bp, D)

    vmem = pl.BlockSpec(memory_space=pltpu.MemorySpace.VMEM)
    cost = pl.CostEstimate(
        flops=(2 * S * Bp * D * 4 * H            # input projection
               + 2 * S * Bp * H * 4 * H          # recurrence
               + 2 * S * Bp * H * OUT),          # output head
        transcendentals=5 * S * Bp * H,
        bytes_accessed=4 * (x_flat.size + wih_p.size + whh_p.size + b_p.size
                            + wout_p.size + bout_p.size
                            + S * Bp * OUT + 2 * Bp * H),
    )

    logits_pad, hn_p, cn_p = pl.pallas_call(
        _make_rllstm_kernel(S, Bp, H),
        out_shape=(
            jax.ShapeDtypeStruct((S * Bp, OUT), f32),   # lane-dense logits slab
            jax.ShapeDtypeStruct((Bp, H), f32),         # h_n (batch-padded)
            jax.ShapeDtypeStruct((Bp, H), f32),         # c_n (batch-padded)
        ),
        in_specs=[vmem] * 6,
        out_specs=(vmem, vmem, vmem),
        cost_estimate=cost,
    )(x_flat, wih_p, whh_p, b_p, wout_p, bout_p)

    logits = jnp.transpose(logits_pad.reshape(S, Bp, OUT), (1, 0, 2))[:B, :, :A]
    # torch.nn.LSTM returns (num_layers=1, batch, hidden) states
    h_n = hn_p[:B, :][None, :, :]
    c_n = cn_p[:B, :][None, :, :]
    return logits, (h_n, c_n)


def _reference_forward(x_bsd, params):
    """Pure-JAX reference (lax.scan) mirroring torch.nn.LSTM + Linear.

    Uses Precision.HIGHEST so the baseline is true f32 (XLA's default f32 dot
    on TPU would otherwise be a single bf16 pass and be the *less* accurate
    side of the comparison).
    """
    H = params["w_hh"].shape[1]
    hp = jax.lax.Precision.HIGHEST
    wih_t = params["w_ih"].T
    whh_t = params["w_hh"].T
    b = params["b_ih"] + params["b_hh"]
    wout_t = params["w_out"].T
    bout = params["b_out"]

    def step(carry, x_t):
        h, c = carry
        gates = (jnp.dot(x_t, wih_t, precision=hp)
                 + jnp.dot(h, whh_t, precision=hp) + b)
        i, f, g, o = jnp.split(gates, 4, axis=-1)
        c = jax.nn.sigmoid(f) * c + jax.nn.sigmoid(i) * jnp.tanh(g)
        h = jax.nn.sigmoid(o) * jnp.tanh(c)
        return (h, c), jnp.dot(h, wout_t, precision=hp) + bout

    B = x_bsd.shape[0]
    h0 = jnp.zeros((B, H), jnp.float32)
    c0 = jnp.zeros((B, H), jnp.float32)
    (h_n, c_n), logits_sba = jax.lax.scan(step, (h0, c0),
                                          jnp.transpose(x_bsd, (1, 0, 2)))
    return jnp.transpose(logits_sba, (1, 0, 2)), (h_n[None], c_n[None])


def init_params(key, n_cells, n_actions):
    """Deterministic init mimicking torch default U(-1/sqrt(H), 1/sqrt(H))."""
    D = n_actions * 2
    H = n_cells
    k = 1.0 / jnp.sqrt(jnp.float32(H))
    keys = jax.random.split(key, 6)
    u = lambda kk, shape: jax.random.uniform(kk, shape, jnp.float32, -k, k)
    return {
        "w_ih": u(keys[0], (4 * H, D)),       # torch weight_ih_l0
        "w_hh": u(keys[1], (4 * H, H)),       # torch weight_hh_l0
        "b_ih": u(keys[2], (4 * H,)),
        "b_hh": u(keys[3], (4 * H,)),
        "w_out": u(keys[4], (n_actions, H)),  # torch lin_out.weight
        "b_out": u(keys[5], (n_actions,)),
    }


if __name__ == "__main__":
    n_cells, n_actions = 32, 4
    batch, seq = 2, 8

    key = jax.random.PRNGKey(0)
    pkey, xkey = jax.random.split(key)
    params = init_params(pkey, n_cells, n_actions)
    x = jax.random.normal(xkey, (batch, seq, n_actions * 2), jnp.float32)

    forward = jax.jit(rllstm_forward)
    logits, (h_n, c_n) = jax.block_until_ready(forward(x, params))

    ref_logits, (ref_h, ref_c) = _reference_forward(x, params)
    assert logits.shape == (batch, seq, n_actions)
    assert h_n.shape == (1, batch, n_cells) and c_n.shape == (1, batch, n_cells)
    assert jnp.allclose(logits, ref_logits, atol=1e-4, rtol=1e-4)
    assert jnp.allclose(h_n, ref_h, atol=1e-4, rtol=1e-4)
    assert jnp.allclose(c_n, ref_c, atol=1e-4, rtol=1e-4)

    print("KERNEL_OK")
</pallas_src>

<mosaic_0001>
module attributes {stable_mosaic.version = 11 : i64} {
  func.func @kernel(%arg0: memref<64x8xf32, #tpu.memory_space<vmem>>, %arg1: memref<8x128xf32, #tpu.memory_space<vmem>>, %arg2: memref<32x128xf32, #tpu.memory_space<vmem>>, %arg3: memref<1x128xf32, #tpu.memory_space<vmem>>, %arg4: memref<32x128xf32, #tpu.memory_space<vmem>>, %arg5: memref<1x128xf32, #tpu.memory_space<vmem>>, %arg6: memref<64x128xf32, #tpu.memory_space<vmem>>, %arg7: memref<8x32xf32, #tpu.memory_space<vmem>>, %arg8: memref<8x32xf32, #tpu.memory_space<vmem>>) attributes {dimension_semantics = [], scalar_prefetch = 0 : i64, scratch_operands = 0 : i64, tpu.core_type = #tpu.core_type<tc>} {
    %c0 = arith.constant 0 : index
    %c0_0 = arith.constant 0 : index
    %0 = vector.load %arg0[%c0, %c0_0] : memref<64x8xf32, #tpu.memory_space<vmem>>, vector<64x8xf32>
    %c0_1 = arith.constant 0 : index
    %c0_2 = arith.constant 0 : index
    %1 = vector.load %arg1[%c0_1, %c0_2] : memref<8x128xf32, #tpu.memory_space<vmem>>, vector<8x128xf32>
    %cst = arith.constant dense<0.000000e+00> : vector<64x128xf32>
    %2 = tpu.matmul %0, %1, %cst {dimension_numbers = #tpu.dot_dimension_numbers<[1], [0], [0], [1], [0, 0, 1, 1], [], []>} : vector<64x8xf32>, vector<8x128xf32>, vector<64x128xf32> -> vector<64x128xf32>
    %c0_3 = arith.constant 0 : index
    %c0_4 = arith.constant 0 : index
    %3 = vector.load %arg3[%c0_3, %c0_4] : memref<1x128xf32, #tpu.memory_space<vmem>>, vector<1x128xf32>
    %4 = vector.broadcast %3 : vector<1x128xf32> to vector<64x128xf32>
    %5 = arith.addf %2, %4 : vector<64x128xf32>
    %c0_5 = arith.constant 0 : index
    %c0_6 = arith.constant 0 : index
    %6 = vector.load %arg2[%c0_5, %c0_6] : memref<32x128xf32, #tpu.memory_space<vmem>>, vector<32x128xf32>
    %cst_7 = arith.constant 0.000000e+00 : f32
    %7 = vector.broadcast %cst_7 : f32 to vector<8x32xf32>
    %cst_8 = arith.constant 0.000000e+00 : f32
    %8 = vector.broadcast %cst_8 : f32 to vector<8x32xf32>
    %9 = vector.extract_strided_slice %5 {offsets = [0, 0], sizes = [8, 128], strides = [1, 1]} : vector<64x128xf32> to vector<8x128xf32>
    %cst_9 = arith.constant dense<0.000000e+00> : vector<8x128xf32>
    %10 = tpu.matmul %7, %6, %cst_9 {dimension_numbers = #tpu.dot_dimension_numbers<[1], [0], [0], [1], [0, 0, 1, 1], [], []>} : vector<8x32xf32>, vector<32x128xf32>, vector<8x128xf32> -> vector<8x128xf32>
    %11 = arith.addf %9, %10 : vector<8x128xf32>
    %12 = vector.extract_strided_slice %11 {offsets = [0, 0], sizes = [8, 32], strides = [1, 1]} : vector<8x128xf32> to vector<8x32xf32>
    %13 = arith.negf %12 : vector<8x32xf32>
    %14 = math.exp %13 : vector<8x32xf32>
    %cst_10 = arith.constant 1.000000e+00 : f32
    %15 = vector.broadcast %cst_10 : f32 to vector<8x32xf32>
    %16 = arith.addf %15, %14 : vector<8x32xf32>
    %17 = arith.divf %15, %16 : vector<8x32xf32>
    %18 = vector.extract_strided_slice %11 {offsets = [0, 32], sizes = [8, 32], strides = [1, 1]} : vector<8x128xf32> to vector<8x32xf32>
    %19 = arith.negf %18 : vector<8x32xf32>
    %20 = math.exp %19 : vector<8x32xf32>
    %cst_11 = arith.constant 1.000000e+00 : f32
    %21 = vector.broadcast %cst_11 : f32 to vector<8x32xf32>
    %22 = arith.addf %21, %20 : vector<8x32xf32>
    %23 = arith.divf %21, %22 : vector<8x32xf32>
    %24 = vector.extract_strided_slice %11 {offsets = [0, 64], sizes = [8, 32], strides = [1, 1]} : vector<8x128xf32> to vector<8x32xf32>
    %25 = math.tanh %24 : vector<8x32xf32>
    %26 = vector.extract_strided_slice %11 {offsets = [0, 96], sizes = [8, 32], strides = [1, 1]} : vector<8x128xf32> to vector<8x32xf32>
    %27 = arith.negf %26 : vector<8x32xf32>
    %28 = math.exp %27 : vector<8x32xf32>
    %cst_12 = arith.constant 1.000000e+00 : f32
    %29 = vector.broadcast %cst_12 : f32 to vector<8x32xf32>
    %30 = arith.addf %29, %28 : vector<8x32xf32>
    %31 = arith.divf %29, %30 : vector<8x32xf32>
    %32 = arith.mulf %23, %8 : vector<8x32xf32>
    %33 = arith.mulf %17, %25 : vector<8x32xf32>
    %34 = arith.addf %32, %33 : vector<8x32xf32>
    %35 = math.tanh %34 : vector<8x32xf32>
    %36 = arith.mulf %31, %35 : vector<8x32xf32>
    %37 = vector.extract_strided_slice %5 {offsets = [8, 0], sizes = [8, 128], strides = [1, 1]} : vector<64x128xf32> to vector<8x128xf32>
    %cst_13 = arith.constant dense<0.000000e+00> : vector<8x128xf32>
    %38 = tpu.matmul %36, %6, %cst_13 {dimension_numbers = #tpu.dot_dimension_numbers<[1], [0], [0], [1], [0, 0, 1, 1], [], []>} : vector<8x32xf32>, vector<32x128xf32>, vector<8x128xf32> -> vector<8x128xf32>
    %39 = arith.addf %37, %38 : vector<8x128xf32>
    %40 = vector.extract_strided_slice %39 {offsets = [0, 0], sizes = [8, 32], strides = [1, 1]} : vector<8x128xf32> to vector<8x32xf32>
    %41 = arith.negf %40 : vector<8x32xf32>
    %42 = math.exp %41 : vector<8x32xf32>
    %cst_14 = arith.constant 1.000000e+00 : f32
    %43 = vector.broadcast %cst_14 : f32 to vector<8x32xf32>
    %44 = arith.addf %43, %42 : vector<8x32xf32>
    %45 = arith.divf %43, %44 : vector<8x32xf32>
    %46 = vector.extract_strided_slice %39 {offsets = [0, 32], sizes = [8, 32], strides = [1, 1]} : vector<8x128xf32> to vector<8x32xf32>
    %47 = arith.negf %46 : vector<8x32xf32>
    %48 = math.exp %47 : vector<8x32xf32>
    %cst_15 = arith.constant 1.000000e+00 : f32
    %49 = vector.broadcast %cst_15 : f32 to vector<8x32xf32>
    %50 = arith.addf %49, %48 : vector<8x32xf32>
    %51 = arith.divf %49, %50 : vector<8x32xf32>
    %52 = vector.extract_strided_slice %39 {offsets = [0, 64], sizes = [8, 32], strides = [1, 1]} : vector<8x128xf32> to vector<8x32xf32>
    %53 = math.tanh %52 : vector<8x32xf32>
    %54 = vector.extract_strided_slice %39 {offsets = [0, 96], sizes = [8, 32], strides = [1, 1]} : vector<8x128xf32> to vector<8x32xf32>
    %55 = arith.negf %54 : vector<8x32xf32>
    %56 = math.exp %55 : vector<8x32xf32>
    %cst_16 = arith.constant 1.000000e+00 : f32
    %57 = vector.broadcast %cst_16 : f32 to vector<8x32xf32>
    %58 = arith.addf %57, %56 : vector<8x32xf32>
    %59 = arith.divf %57, %58 : vector<8x32xf32>
    %60 = arith.mulf %51, %34 : vector<8x32xf32>
    %61 = arith.mulf %45, %53 : vector<8x32xf32>
    %62 = arith.addf %60, %61 : vector<8x32xf32>
    %63 = math.tanh %62 : vector<8x32xf32>
    %64 = arith.mulf %59, %63 : vector<8x32xf32>
    %65 = vector.extract_strided_slice %5 {offsets = [16, 0], sizes = [8, 128], strides = [1, 1]} : vector<64x128xf32> to vector<8x128xf32>
    %cst_17 = arith.constant dense<0.000000e+00> : vector<8x128xf32>
    %66 = tpu.matmul %64, %6, %cst_17 {dimension_numbers = #tpu.dot_dimension_numbers<[1], [0], [0], [1], [0, 0, 1, 1], [], []>} : vector<8x32xf32>, vector<32x128xf32>, vector<8x128xf32> -> vector<8x128xf32>
    %67 = arith.addf %65, %66 : vector<8x128xf32>
    %68 = vector.extract_strided_slice %67 {offsets = [0, 0], sizes = [8, 32], strides = [1, 1]} : vector<8x128xf32> to vector<8x32xf32>
    %69 = arith.negf %68 : vector<8x32xf32>
    %70 = math.exp %69 : vector<8x32xf32>
    %cst_18 = arith.constant 1.000000e+00 : f32
    %71 = vector.broadcast %cst_18 : f32 to vector<8x32xf32>
    %72 = arith.addf %71, %70 : vector<8x32xf32>
    %73 = arith.divf %71, %72 : vector<8x32xf32>
    %74 = vector.extract_strided_slice %67 {offsets = [0, 32], sizes = [8, 32], strides = [1, 1]} : vector<8x128xf32> to vector<8x32xf32>
    %75 = arith.negf %74 : vector<8x32xf32>
    %76 = math.exp %75 : vector<8x32xf32>
    %cst_19 = arith.constant 1.000000e+00 : f32
    %77 = vector.broadcast %cst_19 : f32 to vector<8x32xf32>
    %78 = arith.addf %77, %76 : vector<8x32xf32>
    %79 = arith.divf %77, %78 : vector<8x32xf32>
    %80 = vector.extract_strided_slice %67 {offsets = [0, 64], sizes = [8, 32], strides = [1, 1]} : vector<8x128xf32> to vector<8x32xf32>
    %81 = math.tanh %80 : vector<8x32xf32>
    %82 = vector.extract_strided_slice %67 {offsets = [0, 96], sizes = [8, 32], strides = [1, 1]} : vector<8x128xf32> to vector<8x32xf32>
    %83 = arith.negf %82 : vector<8x32xf32>
    %84 = math.exp %83 : vector<8x32xf32>
    %cst_20 = arith.constant 1.000000e+00 : f32
    %85 = vector.broadcast %cst_20 : f32 to vector<8x32xf32>
    %86 = arith.addf %85, %84 : vector<8x32xf32>
    %87 = arith.divf %85, %86 : vector<8x32xf32>
    %88 = arith.mulf %79, %62 : vector<8x32xf32>
    %89 = arith.mulf %73, %81 : vector<8x32xf32>
    %90 = arith.addf %88, %89 : vector<8x32xf32>
    %91 = math.tanh %90 : vector<8x32xf32>
    %92 = arith.mulf %87, %91 : vector<8x32xf32>
    %93 = vector.extract_strided_slice %5 {offsets = [24, 0], sizes = [8, 128], strides = [1, 1]} : vector<64x128xf32> to vector<8x128xf32>
    %cst_21 = arith.constant dense<0.000000e+00> : vector<8x128xf32>
    %94 = tpu.matmul %92, %6, %cst_21 {dimension_numbers = #tpu.dot_dimension_numbers<[1], [0], [0], [1], [0, 0, 1, 1], [], []>} : vector<8x32xf32>, vector<32x128xf32>, vector<8x128xf32> -> vector<8x128xf32>
    %95 = arith.addf %93, %94 : vector<8x128xf32>
    %96 = vector.extract_strided_slice %95 {offsets = [0, 0], sizes = [8, 32], strides = [1, 1]} : vector<8x128xf32> to vector<8x32xf32>
    %97 = arith.negf %96 : vector<8x32xf32>
    %98 = math.exp %97 : vector<8x32xf32>
    %cst_22 = arith.constant 1.000000e+00 : f32
    %99 = vector.broadcast %cst_22 : f32 to vector<8x32xf32>
    %100 = arith.addf %99, %98 : vector<8x32xf32>
    %101 = arith.divf %99, %100 : vector<8x32xf32>
    %102 = vector.extract_strided_slice %95 {offsets = [0, 32], sizes = [8, 32], strides = [1, 1]} : vector<8x128xf32> to vector<8x32xf32>
    %103 = arith.negf %102 : vector<8x32xf32>
    %104 = math.exp %103 : vector<8x32xf32>
    %cst_23 = arith.constant 1.000000e+00 : f32
    %105 = vector.broadcast %cst_23 : f32 to vector<8x32xf32>
    %106 = arith.addf %105, %104 : vector<8x32xf32>
    %107 = arith.divf %105, %106 : vector<8x32xf32>
    %108 = vector.extract_strided_slice %95 {offsets = [0, 64], sizes = [8, 32], strides = [1, 1]} : vector<8x128xf32> to vector<8x32xf32>
    %109 = math.tanh %108 : vector<8x32xf32>
    %110 = vector.extract_strided_slice %95 {offsets = [0, 96], sizes = [8, 32], strides = [1, 1]} : vector<8x128xf32> to vector<8x32xf32>
    %111 = arith.negf %110 : vector<8x32xf32>
    %112 = math.exp %111 : vector<8x32xf32>
    %cst_24 = arith.constant 1.000000e+00 : f32
    %113 = vector.broadcast %cst_24 : f32 to vector<8x32xf32>
    %114 = arith.addf %113, %112 : vector<8x32xf32>
    %115 = arith.divf %113, %114 : vector<8x32xf32>
    %116 = arith.mulf %107, %90 : vector<8x32xf32>
    %117 = arith.mulf %101, %109 : vector<8x32xf32>
    %118 = arith.addf %116, %117 : vector<8x32xf32>
    %119 = math.tanh %118 : vector<8x32xf32>
    %120 = arith.mulf %115, %119 : vector<8x32xf32>
    %121 = vector.extract_strided_slice %5 {offsets = [32, 0], sizes = [8, 128], strides = [1, 1]} : vector<64x128xf32> to vector<8x128xf32>
    %cst_25 = arith.constant dense<0.000000e+00> : vector<8x128xf32>
    %122 = tpu.matmul %120, %6, %cst_25 {dimension_numbers = #tpu.dot_dimension_numbers<[1], [0], [0], [1], [0, 0, 1, 1], [], []>} : vector<8x32xf32>, vector<32x128xf32>, vector<8x128xf32> -> vector<8x128xf32>
    %123 = arith.addf %121, %122 : vector<8x128xf32>
    %124 = vector.extract_strided_slice %123 {offsets = [0, 0], sizes = [8, 32], strides = [1, 1]} : vector<8x128xf32> to vector<8x32xf32>
    %125 = arith.negf %124 : vector<8x32xf32>
    %126 = math.exp %125 : vector<8x32xf32>
    %cst_26 = arith.constant 1.000000e+00 : f32
    %127 = vector.broadcast %cst_26 : f32 to vector<8x32xf32>
    %128 = arith.addf %127, %126 : vector<8x32xf32>
    %129 = arith.divf %127, %128 : vector<8x32xf32>
    %130 = vector.extract_strided_slice %123 {offsets = [0, 32], sizes = [8, 32], strides = [1, 1]} : vector<8x128xf32> to vector<8x32xf32>
    %131 = arith.negf %130 : vector<8x32xf32>
    %132 = math.exp %131 : vector<8x32xf32>
    %cst_27 = arith.constant 1.000000e+00 : f32
    %133 = vector.broadcast %cst_27 : f32 to vector<8x32xf32>
    %134 = arith.addf %133, %132 : vector<8x32xf32>
    %135 = arith.divf %133, %134 : vector<8x32xf32>
    %136 = vector.extract_strided_slice %123 {offsets = [0, 64], sizes = [8, 32], strides = [1, 1]} : vector<8x128xf32> to vector<8x32xf32>
    %137 = math.tanh %136 : vector<8x32xf32>
    %138 = vector.extract_strided_slice %123 {offsets = [0, 96], sizes = [8, 32], strides = [1, 1]} : vector<8x128xf32> to vector<8x32xf32>
    %139 = arith.negf %138 : vector<8x32xf32>
    %140 = math.exp %139 : vector<8x32xf32>
    %cst_28 = arith.constant 1.000000e+00 : f32
    %141 = vector.broadcast %cst_28 : f32 to vector<8x32xf32>
    %142 = arith.addf %141, %140 : vector<8x32xf32>
    %143 = arith.divf %141, %142 : vector<8x32xf32>
    %144 = arith.mulf %135, %118 : vector<8x32xf32>
    %145 = arith.mulf %129, %137 : vector<8x32xf32>
    %146 = arith.addf %144, %145 : vector<8x32xf32>
    %147 = math.tanh %146 : vector<8x32xf32>
    %148 = arith.mulf %143, %147 : vector<8x32xf32>
    %149 = vector.extract_strided_slice %5 {offsets = [40, 0], sizes = [8, 128], strides = [1, 1]} : vector<64x128xf32> to vector<8x128xf32>
    %cst_29 = arith.constant dense<0.000000e+00> : vector<8x128xf32>
    %150 = tpu.matmul %148, %6, %cst_29 {dimension_numbers = #tpu.dot_dimension_numbers<[1], [0], [0], [1], [0, 0, 1, 1], [], []>} : vector<8x32xf32>, vector<32x128xf32>, vector<8x128xf32> -> vector<8x128xf32>
    %151 = arith.addf %149, %150 : vector<8x128xf32>
    %152 = vector.extract_strided_slice %151 {offsets = [0, 0], sizes = [8, 32], strides = [1, 1]} : vector<8x128xf32> to vector<8x32xf32>
    %153 = arith.negf %152 : vector<8x32xf32>
    %154 = math.exp %153 : vector<8x32xf32>
    %cst_30 = arith.constant 1.000000e+00 : f32
    %155 = vector.broadcast %cst_30 : f32 to vector<8x32xf32>
    %156 = arith.addf %155, %154 : vector<8x32xf32>
    %157 = arith.divf %155, %156 : vector<8x32xf32>
    %158 = vector.extract_strided_slice %151 {offsets = [0, 32], sizes = [8, 32], strides = [1, 1]} : vector<8x128xf32> to vector<8x32xf32>
    %159 = arith.negf %158 : vector<8x32xf32>
    %160 = math.exp %159 : vector<8x32xf32>
    %cst_31 = arith.constant 1.000000e+00 : f32
    %161 = vector.broadcast %cst_31 : f32 to vector<8x32xf32>
    %162 = arith.addf %161, %160 : vector<8x32xf32>
    %163 = arith.divf %161, %162 : vector<8x32xf32>
    %164 = vector.extract_strided_slice %151 {offsets = [0, 64], sizes = [8, 32], strides = [1, 1]} : vector<8x128xf32> to vector<8x32xf32>
    %165 = math.tanh %164 : vector<8x32xf32>
    %166 = vector.extract_strided_slice %151 {offsets = [0, 96], sizes = [8, 32], strides = [1, 1]} : vector<8x128xf32> to vector<8x32xf32>
    %167 = arith.negf %166 : vector<8x32xf32>
    %168 = math.exp %167 : vector<8x32xf32>
    %cst_32 = arith.constant 1.000000e+00 : f32
    %169 = vector.broadcast %cst_32 : f32 to vector<8x32xf32>
    %170 = arith.addf %169, %168 : vector<8x32xf32>
    %171 = arith.divf %169, %170 : vector<8x32xf32>
    %172 = arith.mulf %163, %146 : vector<8x32xf32>
    %173 = arith.mulf %157, %165 : vector<8x32xf32>
    %174 = arith.addf %172, %173 : vector<8x32xf32>
    %175 = math.tanh %174 : vector<8x32xf32>
    %176 = arith.mulf %171, %175 : vector<8x32xf32>
    %177 = vector.extract_strided_slice %5 {offsets = [48, 0], sizes = [8, 128], strides = [1, 1]} : vector<64x128xf32> to vector<8x128xf32>
    %cst_33 = arith.constant dense<0.000000e+00> : vector<8x128xf32>
    %178 = tpu.matmul %176, %6, %cst_33 {dimension_numbers = #tpu.dot_dimension_numbers<[1], [0], [0], [1], [0, 0, 1, 1], [], []>} : vector<8x32xf32>, vector<32x128xf32>, vector<8x128xf32> -> vector<8x128xf32>
    %179 = arith.addf %177, %178 : vector<8x128xf32>
    %180 = vector.extract_strided_slice %179 {offsets = [0, 0], sizes = [8, 32], strides = [1, 1]} : vector<8x128xf32> to vector<8x32xf32>
    %181 = arith.negf %180 : vector<8x32xf32>
    %182 = math.exp %181 : vector<8x32xf32>
    %cst_34 = arith.constant 1.000000e+00 : f32
    %183 = vector.broadcast %cst_34 : f32 to vector<8x32xf32>
    %184 = arith.addf %183, %182 : vector<8x32xf32>
    %185 = arith.divf %183, %184 : vector<8x32xf32>
    %186 = vector.extract_strided_slice %179 {offsets = [0, 32], sizes = [8, 32], strides = [1, 1]} : vector<8x128xf32> to vector<8x32xf32>
    %187 = arith.negf %186 : vector<8x32xf32>
    %188 = math.exp %187 : vector<8x32xf32>
    %cst_35 = arith.constant 1.000000e+00 : f32
    %189 = vector.broadcast %cst_35 : f32 to vector<8x32xf32>
    %190 = arith.addf %189, %188 : vector<8x32xf32>
    %191 = arith.divf %189, %190 : vector<8x32xf32>
    %192 = vector.extract_strided_slice %179 {offsets = [0, 64], sizes = [8, 32], strides = [1, 1]} : vector<8x128xf32> to vector<8x32xf32>
    %193 = math.tanh %192 : vector<8x32xf32>
    %194 = vector.extract_strided_slice %179 {offsets = [0, 96], sizes = [8, 32], strides = [1, 1]} : vector<8x128xf32> to vector<8x32xf32>
    %195 = arith.negf %194 : vector<8x32xf32>
    %196 = math.exp %195 : vector<8x32xf32>
    %cst_36 = arith.constant 1.000000e+00 : f32
    %197 = vector.broadcast %cst_36 : f32 to vector<8x32xf32>
    %198 = arith.addf %197, %196 : vector<8x32xf32>
    %199 = arith.divf %197, %198 : vector<8x32xf32>
    %200 = arith.mulf %191, %174 : vector<8x32xf32>
    %201 = arith.mulf %185, %193 : vector<8x32xf32>
    %202 = arith.addf %200, %201 : vector<8x32xf32>
    %203 = math.tanh %202 : vector<8x32xf32>
    %204 = arith.mulf %199, %203 : vector<8x32xf32>
    %205 = vector.extract_strided_slice %5 {offsets = [56, 0], sizes = [8, 128], strides = [1, 1]} : vector<64x128xf32> to vector<8x128xf32>
    %cst_37 = arith.constant dense<0.000000e+00> : vector<8x128xf32>
    %206 = tpu.matmul %204, %6, %cst_37 {dimension_numbers = #tpu.dot_dimension_numbers<[1], [0], [0], [1], [0, 0, 1, 1], [], []>} : vector<8x32xf32>, vector<32x128xf32>, vector<8x128xf32> -> vector<8x128xf32>
    %207 = arith.addf %205, %206 : vector<8x128xf32>
    %208 = vector.extract_strided_slice %207 {offsets = [0, 0], sizes = [8, 32], strides = [1, 1]} : vector<8x128xf32> to vector<8x32xf32>
    %209 = arith.negf %208 : vector<8x32xf32>
    %210 = math.exp %209 : vector<8x32xf32>
    %cst_38 = arith.constant 1.000000e+00 : f32
    %211 = vector.broadcast %cst_38 : f32 to vector<8x32xf32>
    %212 = arith.addf %211, %210 : vector<8x32xf32>
    %213 = arith.divf %211, %212 : vector<8x32xf32>
    %214 = vector.extract_strided_slice %207 {offsets = [0, 32], sizes = [8, 32], strides = [1, 1]} : vector<8x128xf32> to vector<8x32xf32>
    %215 = arith.negf %214 : vector<8x32xf32>
    %216 = math.exp %215 : vector<8x32xf32>
    %cst_39 = arith.constant 1.000000e+00 : f32
    %217 = vector.broadcast %cst_39 : f32 to vector<8x32xf32>
    %218 = arith.addf %217, %216 : vector<8x32xf32>
    %219 = arith.divf %217, %218 : vector<8x32xf32>
    %220 = vector.extract_strided_slice %207 {offsets = [0, 64], sizes = [8, 32], strides = [1, 1]} : vector<8x128xf32> to vector<8x32xf32>
    %221 = math.tanh %220 : vector<8x32xf32>
    %222 = vector.extract_strided_slice %207 {offsets = [0, 96], sizes = [8, 32], strides = [1, 1]} : vector<8x128xf32> to vector<8x32xf32>
    %223 = arith.negf %222 : vector<8x32xf32>
    %224 = math.exp %223 : vector<8x32xf32>
    %cst_40 = arith.constant 1.000000e+00 : f32
    %225 = vector.broadcast %cst_40 : f32 to vector<8x32xf32>
    %226 = arith.addf %225, %224 : vector<8x32xf32>
    %227 = arith.divf %225, %226 : vector<8x32xf32>
    %228 = arith.mulf %219, %202 : vector<8x32xf32>
    %229 = arith.mulf %213, %221 : vector<8x32xf32>
    %230 = arith.addf %228, %229 : vector<8x32xf32>
    %231 = math.tanh %230 : vector<8x32xf32>
    %232 = arith.mulf %227, %231 : vector<8x32xf32>
    %c0_41 = arith.constant 0 : index
    %c0_42 = arith.constant 0 : index
    %233 = vector.load %arg7[%c0_41, %c0_42] : memref<8x32xf32, #tpu.memory_space<vmem>>, vector<8x32xf32>
    tpu.vector_store %arg7[%c0_41, %c0_42], %232 {strides = array<i32>} : memref<8x32xf32, #tpu.memory_space<vmem>>, vector<8x32xf32>,
    %c0_43 = arith.constant 0 : index
    %c0_44 = arith.constant 0 : index
    %234 = vector.load %arg8[%c0_43, %c0_44] : memref<8x32xf32, #tpu.memory_space<vmem>>, vector<8x32xf32>
    tpu.vector_store %arg8[%c0_43, %c0_44], %230 {strides = array<i32>} : memref<8x32xf32, #tpu.memory_space<vmem>>, vector<8x32xf32>,
    %235 = tpu.concatenate %36, %64, %92, %120, %148, %176, %204, %232 in 0 : vector<8x32xf32>, vector<8x32xf32>, vector<8x32xf32>, vector<8x32xf32>, vector<8x32xf32>, vector<8x32xf32>, vector<8x32xf32>, vector<8x32xf32> -> vector<64x32xf32>
    %c0_45 = arith.constant 0 : index
    %c0_46 = arith.constant 0 : index
    %236 = vector.load %arg4[%c0_45, %c0_46] : memref<32x128xf32, #tpu.memory_space<vmem>>, vector<32x128xf32>
    %cst_47 = arith.constant dense<0.000000e+00> : vector<64x128xf32>
    %237 = tpu.matmul %235, %236, %cst_47 {dimension_numbers = #tpu.dot_dimension_numbers<[1], [0], [0], [1], [0, 0, 1, 1], [], []>} : vector<64x32xf32>, vector<32x128xf32>, vector<64x128xf32> -> vector<64x128xf32>
    %c0_48 = arith.constant 0 : index
    %c0_49 = arith.constant 0 : index
    %238 = vector.load %arg5[%c0_48, %c0_49] : memref<1x128xf32, #tpu.memory_space<vmem>>, vector<1x128xf32>
    %239 = vector.broadcast %238 : vector<1x128xf32> to vector<64x128xf32>
    %240 = arith.addf %237, %239 : vector<64x128xf32>
    %c0_50 = arith.constant 0 : index
    %c0_51 = arith.constant 0 : index
    %241 = vector.load %arg6[%c0_50, %c0_51] : memref<64x128xf32, #tpu.memory_space<vmem>>, vector<64x128xf32>
    tpu.vector_store %arg6[%c0_50, %c0_51], %240 {strides = array<i32>} : memref<64x128xf32, #tpu.memory_space<vmem>>, vector<64x128xf32>,
    return
  }
}

</mosaic_0001>

<bundles_post_ra>
// kernel: rllstm_forward.1
= control target key start
LH: loop header
LB: loop body
LE: loop exit
PB: predicated region body
PF: predicated region fallthrough
CT: control target
= control target key end

     0   :  { %vm42_vm0 = vcmask 64512   ;;  %v1410_v5 = vmov 0.0   ;;  %vm1411_vm1 = vmmov 0   ;;  %s1412_s27 = smov 64   ;;  %vm176_vm2 = vcmask 261120   ;;  %s1414_s28 = smov 96   ;;  %s1745_s1 = inlined_call_operand.vmem [shape: f32[8,128], index: 1, kind: input, shape index: {}]   ;;  %s1746_s0 = inlined_call_operand.vmem [shape: f32[64,8], index: 0, kind: input, shape index: {}]   ;;  %s1747_s2 = inlined_call_operand.vmem [shape: f32[32,128], index: 2, kind: input, shape index: {}]   ;;  %s1748_s3 = inlined_call_operand.vmem [shape: f32[1,128], index: 3, kind: input, shape index: {}]   ;;  %s1749_s4 = inlined_call_operand.vmem [shape: f32[32,128], index: 4, kind: input, shape index: {}]   ;;  %s1750_s5 = inlined_call_operand.vmem [shape: f32[1,128], index: 5, kind: input, shape index: {}]   ;;  %s1751_s6 = inlined_call_operand.vmem [shape: f32[64,128], index: 6, kind: output, shape index: {0}]   ;;  %s1752_s8 = inlined_call_operand.vmem [shape: f32[8,32], index: 8, kind: output, shape index: {2}]   ;;  %s1753_s7 = inlined_call_operand.vmem [shape: f32[8,32], index: 7, kind: output, shape index: {1}]  }
   0x1   :  { %v34_v0 = vld [vmem:[%s1745_s1] sm:$0xff]  ;;  %v31_v2 = vld [vmem:[%s1746_s0 + $0x28] sm:$0xff]  ;;  %v1473_v3 = vld [vmem:[%s1747_s2 + $0x18] sm:$0xff] }
   0x2   :  { %v30_v1 = vld [vmem:[%s1746_s0 + $0x20] sm:$0xff]  ;;  %1339 = vmatprep.subr.mxu1 %v34_v0  ;;  %1217 = vmatprep.subr.mxu0 %v34_v0  ;;  %v27_v6 = vld [vmem:[%s1746_s0 + $0x8] sm:$0xff]  ;;  %v32_v7 = vld [vmem:[%s1746_s0 + $0x30] sm:$0xff] }
   0x3   :  { %1225 = vmatprep.mubr.msk.f32.mxu1 %vm42_vm0, %v30_v1  ;;  %1340 = vmatpush3.msra.mxu1 %v34_v0  ;;  %v26_v4 = vld [vmem:[%s1746_s0] sm:$0xff]  ;;  %v1490_v8 = vld [vmem:[%s1747_s2 + $0x10] sm:$0xff]  ;;  %v33_v9 = vld [vmem:[%s1746_s0 + $0x38] sm:$0xff] }
   0x4   :  { %1226 = vmatmul.mubr.msk.f32.vlgmr.msra.gmra.mxu1 %vm42_vm0, %v31_v2  ;;  %1231 = vmatprep.subr.mxu1 %v1410_v5  ;;  %v1502_v10 = vld [vmem:[%s1747_s2 + $0x8] sm:$0xff]  ;;  %v1511_v11 = vld [vmem:[%s1747_s2] sm:$0xff]  ;;  %v28_v51 = vld [vmem:[%s1746_s0 + $0x10] sm:$0xff] }
   0x5   :  { %1232 = vmatpush3.msra.mxu1 %v1473_v3  ;;  %1218 = vmatpush3.msra.mxu0 %v34_v0  ;;  %v1547_v17 = vld [vmem:[%s1748_s3] ss:$0 sm:$0xff]  ;;  %s1413_s3 = smov 32   ;;  %v29_v52 = vld [vmem:[%s1746_s0 + $0x18] sm:$0xff] }
   0x6   :  { %1219 = vmatprep.mubr.msk.f32.mxu0 %vm42_vm0, %v26_v4  ;;  %1233 = vmatprep.subr.mxu1 %v1410_v5 }
   0x7   :  { %1220 = vmatmul.mubr.msk.f32.vlgmr.msra.gmra.mxu0 %vm42_vm0, %v27_v6  ;;  %1228 = vmatprep.mubr.msk.f32.mxu1 %vm42_vm0, %v32_v7 }
   0x8   :  { %1234 = vmatpush3.msra.mxu1 %v1490_v8  ;;  %1253 = vmatprep.subr.mxu0 %v1410_v5 }
   0x9   :  { %1229 = vmatmul.mubr.msk.f32.gmra.mxu1 %vm42_vm0, %v33_v9  ;;  %1235 = vmatprep.subr.mxu1 %v1410_v5 }
   0xa   :  { %1236 = vmatpush3.msra.mxu1 %v1502_v10  ;;  %1239 = vmatprep.mubr.msk.f32.mxu1 %vm1411_vm1, %v1410_v5 }
   0xb   :  { %1237 = vmatprep.subr.mxu1 %v1410_v5  ;;  %1254 = vmatpush3.msra.mxu0 %v1473_v3 }
   0xc   :  { %1238 = vmatpush3.msra.mxu1 %v1511_v11  ;;  %1255 = vmatprep.subr.mxu0 %v1410_v5 }
   0xd   :  { %1240 = vmatmul.mubr.f32.vlgmr.msra.gmra.mxu1 %v1410_v5  ;;  %1242 = vmatprep.subr.mxu1 %v1410_v5 }
   0xe   :  { %1243 = vmatpush3.msra.mxu1 %v1473_v3  ;;  %1250 = vmatprep.mubr.msk.f32.mxu1 %vm1411_vm1, %v1410_v5 }
   0xf   :  { %1244 = vmatprep.subr.mxu1 %v1410_v5  ;;  %1256 = vmatpush3.msra.mxu0 %v1490_v8 }
  0x10   :  { %1245 = vmatpush3.msra.mxu1 %v1490_v8  ;;  %1257 = vmatprep.subr.mxu0 %v1410_v5 }
  0x11   :  { %1246 = vmatprep.subr.mxu1 %v1410_v5  ;;  %1258 = vmatpush3.msra.mxu0 %v1502_v10 }
  0x12   :  { %1247 = vmatpush3.msra.mxu1 %v1502_v10  ;;  %1259 = vmatprep.subr.mxu0 %v1410_v5 }
  0x13   :  { %1248 = vmatprep.subr.mxu1 %v1410_v5  ;;  %1260 = vmatpush3.msra.mxu0 %v1511_v11 }
  0x14   :  { %1249 = vmatpush3.msra.mxu1 %v1511_v11  ;;  %1275 = vmatprep.subr.mxu0 %v1410_v5 }
  0x15   :  { %1264 = vmatprep.subr.mxu1 %v1410_v5  ;;  %1222 = vmatprep.mubr.msk.f32.mxu0 %vm42_vm0, %v28_v51 }
  0x16   :  { %1223 = vmatmul.mubr.msk.f32.gmra.mxu0 %vm42_vm0, %v29_v52 }
  0x17   :  { %1261 = vmatprep.mubr.msk.f32.mxu0 %vm1411_vm1, %v1410_v5 }
  0xc4   :  { %v1538_v12 = vpop.f32.mrf.mxu1 }
  0xc6   :  { %v1540_v13 = vpop.f32.mrf.mxu1 }
  0xc7   :  { %v1221_v14 = vpop.f32.mrf.mxu0 }
  0xc8   :  { %v139_v37 = vadd.f32 %v1221_v14, %v1547_v17 }
  0xc9   :  { %v1542_v15 = vpop.f32.mrf.mxu1  ;;  %v133_v16 = vpop.f32.mrf.mxu0 }
  0xca   :  { %v134_v19 = vadd.f32 %v1547_v17, %v133_v16 }
  0xcb   :  { %v1549_v18 = vpop.f32.mrf.mxu1 }
  0xcd   :  { %v246_v20 = vpop.f32.mrf.mxu1 }
  0xce   :  { %v250_v21 = vadd.f32 %v246_v20, %v134_v19 }
  0xcf   :  { %v1241_v22 = vpop.f32.mrf.mxu1 }
  0xd0   :  { %1346 = vtanh.f32 %v250_v21  ;;  %v1132_v24 = vmul.f32 -1.442695, %v250_v21 }
  0xd2   :  { %1348 = vpow2.f32 %v1132_v24 }
  0xd6   :  { %v1224_v57 = vpop.f32.mrf.mxu0 }
  0xd8   :  { %v143_v58 = vpop.f32.mrf.mxu0 }
  0xd9   :  { %v144_v59 = vadd.f32 %v1547_v17, %v143_v58 }
  0xdd   :  { %v1347_v23 = vpop.eup %1346 }
  0xde   :  { %260 = vrot.lane.b32.xlu0 %v1347_v23, %s1412_s27  ;;  %v149_v23 = vadd.f32 %v1224_v57, %v1547_v17 }
  0xdf   :  { %v1349_v25 = vpop.eup %1348 }
  0xe0   :  { %v254_v26 = vadd.f32 1.0, %v1349_v25 }
  0xe2   :  { %1350 = vrcp.f32 %v254_v26 }
  0xef   :  { %v1351_v27 = vpop.eup %1350 }
  0xf0   :  { %v258_v30 = vmul.f32 0.0, %v1351_v27 }
 0x150   :  { %v261_v28 = vpop.permute.xlu0 %260 }
 0x151   :  { %v263_v29 = vmul.f32 %v1351_v27, %v261_v28 }
 0x153   :  { %265 = vrot.lane.b32.xlu0 %v263_v29, %s1413_s3 }
 0x1c5   :  { %v266_v31 = vpop.permute.xlu0 %265 }
 0x1c6   :  { %v268_v32 = vadd.f32 %v266_v31, %v258_v30 }
 0x1c8   :  { %1352 = vtanh.f32 %v268_v32 }
 0x1d5   :  { %v1353_v33 = vpop.eup %1352 }
 0x1d6   :  { %271 = vrot.lane.b32.xlu1 %v1353_v33, %s1412_s27 }
 0x248   :  { %v272_v34 = vpop.permute.xlu1 %271 }
 0x249   :  { %v274_v35 = vmul.f32 %v1351_v27, %v272_v34 }
 0x24b   :  { %276 = vrot.lane.b32.xlu1 %v274_v35, %s1413_s3 }
 0x2bd   :  { %v1556_v36 = vpop.permute.xlu1 %276 }
 0x2be   :  { %1251 = vmatmul.mubr.msk.f32.vlgmr.msra.gmra.mxu1 %vm176_vm2, %v1556_v36 }
 0x2bf   :  { %1265 = vmatpush3.msra.mxu1 %v1473_v3  ;;  %1272 = vmatprep.mubr.msk.f32.mxu1 %vm1411_vm1, %v1410_v5 }
 0x2c0   :  { %1266 = vmatprep.subr.mxu1 %v1410_v5 }
 0x2c1   :  { %1267 = vmatpush3.msra.mxu1 %v1490_v8 }
 0x2c2   :  { %1268 = vmatprep.subr.mxu1 %v1410_v5 }
 0x2c3   :  { %1269 = vmatpush3.msra.mxu1 %v1502_v10 }
 0x2c4   :  { %1270 = vmatprep.subr.mxu1 %v1410_v5 }
 0x2c5   :  { %1271 = vmatpush3.msra.mxu1 %v1511_v11 }
 0x2c6   :  { %1286 = vmatprep.subr.mxu1 %v1410_v5 }
 0x37e   :  { %v346_v38 = vpop.f32.mrf.mxu1 }
 0x37f   :  { %v350_v39 = vadd.f32 %v346_v38, %v139_v37 }
 0x380   :  { %v1252_v40 = vpop.f32.mrf.mxu1 }
 0x381   :  { %1354 = vtanh.f32 %v350_v39  ;;  %v1134_v42 = vmul.f32 -1.442695, %v350_v39 }
 0x383   :  { %1356 = vpow2.f32 %v1134_v42  ;;  %v154_v42 = vadd.f32 %v1547_v17, %v1540_v13 }
 0x38e   :  { %v1355_v41 = vpop.eup %1354 }
 0x38f   :  { %360 = vrot.lane.b32.xlu0 %v1355_v41, %s1412_s27 }
 0x390   :  { %v1357_v43 = vpop.eup %1356 }
 0x391   :  { %v354_v44 = vadd.f32 1.0, %v1357_v43 }
 0x393   :  { %1358 = vrcp.f32 %v354_v44 }
 0x3a0   :  { %v1359_v45 = vpop.eup %1358 }
 0x3a1   :  { %v358_v48 = vmul.f32 %v1359_v45, %v268_v32 }
 0x401   :  { %v361_v46 = vpop.permute.xlu0 %360 }
 0x402   :  { %v363_v47 = vmul.f32 %v1359_v45, %v361_v46 }
 0x404   :  { %365 = vrot.lane.b32.xlu1 %v363_v47, %s1413_s3 }
 0x476   :  { %v366_v49 = vpop.permute.xlu1 %365 }
 0x477   :  { %v368_v50 = vadd.f32 %v366_v49, %v358_v48 }
 0x479   :  { %1360 = vtanh.f32 %v368_v50 }
 0x486   :  { %v1361_v53 = vpop.eup %1360 }
 0x487   :  { %371 = vrot.lane.b32.xlu0 %v1361_v53, %s1412_s27 }
 0x4f9   :  { %v372_v54 = vpop.permute.xlu0 %371 }
 0x4fa   :  { %v374_v55 = vmul.f32 %v1359_v45, %v372_v54 }
 0x4fc   :  { %376 = vrot.lane.b32.xlu1 %v374_v55, %s1413_s3 }
 0x56e   :  { %v1585_v56 = vpop.permute.xlu1 %376 }
 0x56f   :  { %1262 = vmatmul.mubr.msk.f32.vlgmr.msra.gmra.mxu0 %vm176_vm2, %v1585_v56 }
 0x570   :  { %1276 = vmatpush3.msra.mxu0 %v1473_v3  ;;  %1283 = vmatprep.mubr.msk.f32.mxu0 %vm1411_vm1, %v1410_v5 }
 0x571   :  { %1277 = vmatprep.subr.mxu0 %v1410_v5 }
 0x572   :  { %1278 = vmatpush3.msra.mxu0 %v1490_v8 }
 0x573   :  { %1279 = vmatprep.subr.mxu0 %v1410_v5 }
 0x574   :  { %1280 = vmatpush3.msra.mxu0 %v1502_v10 }
 0x575   :  { %1281 = vmatprep.subr.mxu0 %v1410_v5 }
 0x576   :  { %1282 = vmatpush3.msra.mxu0 %v1511_v11 }
 0x577   :  { %1297 = vmatprep.subr.mxu0 %v1410_v5 }
 0x62f   :  { %v446_v60 = vpop.f32.mrf.mxu0 }
 0x630   :  { %v450_v61 = vadd.f32 %v446_v60, %v144_v59  ;;  %v159_v60 = vadd.f32 %v1538_v12, %v1547_v17 }
 0x631   :  { %v1263_v62 = vpop.f32.mrf.mxu0 }
 0x632   :  { %1362 = vtanh.f32 %v450_v61  ;;  %v1136_v0 = vmul.f32 -1.442695, %v450_v61 }
 0x634   :  { %1364 = vpow2.f32 %v1136_v0 }
 0x63f   :  { %v1363_v63 = vpop.eup %1362 }
 0x640   :  { %460 = vrot.lane.b32.xlu0 %v1363_v63, %s1412_s27 }
 0x641   :  { %v1365_v1 = vpop.eup %1364 }
 0x642   :  { %v454_v2 = vadd.f32 1.0, %v1365_v1 }
 0x644   :  { %1366 = vrcp.f32 %v454_v2 }
 0x651   :  { %v1367_v4 = vpop.eup %1366 }
 0x652   :  { %v458_v9 = vmul.f32 %v1367_v4, %v368_v50 }
 0x6b2   :  { %v461_v6 = vpop.permute.xlu0 %460 }
 0x6b3   :  { %v463_v7 = vmul.f32 %v1367_v4, %v461_v6  ;;  %v988_v6 = vld [vmem:[%s1749_s4 + $0x18] sm:$0xff] }
 0x6b5   :  { %465 = vrot.lane.b32.xlu1 %v463_v7, %s1413_s3 }
 0x727   :  { %v466_v14 = vpop.permute.xlu1 %465 }
 0x728   :  { %v468_v16 = vadd.f32 %v466_v14, %v458_v9 }
 0x72a   :  { %1368 = vtanh.f32 %v468_v16 }
 0x737   :  { %v1369_v19 = vpop.eup %1368 }
 0x738   :  { %471 = vrot.lane.b32.xlu0 %v1369_v19, %s1412_s27  ;;  %v987_v19 = vld [vmem:[%s1749_s4 + $0x10] sm:$0xff] }
 0x7aa   :  { %v472_v20 = vpop.permute.xlu0 %471 }
 0x7ab   :  { %v474_v21 = vmul.f32 %v1367_v4, %v472_v20  ;;  %v986_v20 = vld [vmem:[%s1749_s4 + $0x8] sm:$0xff] }
 0x7ad   :  { %476 = vrot.lane.b32.xlu1 %v474_v21, %s1413_s3  ;;  %v985_v21 = vld [vmem:[%s1749_s4] sm:$0xff] }
 0x81f   :  { %v1604_v22 = vpop.permute.xlu1 %476 }
 0x820   :  { %1273 = vmatmul.mubr.msk.f32.vlgmr.msra.gmra.mxu1 %vm176_vm2, %v1604_v22 }
 0x821   :  { %1287 = vmatpush3.msra.mxu1 %v1473_v3  ;;  %1294 = vmatprep.mubr.msk.f32.mxu1 %vm1411_vm1, %v1410_v5 }
 0x822   :  { %1288 = vmatprep.subr.mxu1 %v1410_v5 }
 0x823   :  { %1289 = vmatpush3.msra.mxu1 %v1490_v8 }
 0x824   :  { %1290 = vmatprep.subr.mxu1 %v1410_v5 }
 0x825   :  { %1291 = vmatpush3.msra.mxu1 %v1502_v10 }
 0x826   :  { %1292 = vmatprep.subr.mxu1 %v1410_v5 }
 0x827   :  { %1293 = vmatpush3.msra.mxu1 %v1511_v11 }
 0x828   :  { %1308 = vmatprep.subr.mxu1 %v1410_v5 }
 0x8e0   :  { %v546_v24 = vpop.f32.mrf.mxu1 }
 0x8e1   :  { %v550_v25 = vadd.f32 %v546_v24, %v149_v23 }
 0x8e2   :  { %v1274_v26 = vpop.f32.mrf.mxu1 }
 0x8e3   :  { %1370 = vtanh.f32 %v550_v25  ;;  %v1138_v28 = vmul.f32 -1.442695, %v550_v25 }
 0x8e5   :  { %1372 = vpow2.f32 %v1138_v28 }
 0x8f0   :  { %v1371_v27 = vpop.eup %1370 }
 0x8f1   :  { %560 = vrot.lane.b32.xlu0 %v1371_v27, %s1412_s27 }
 0x8f2   :  { %v1373_v29 = vpop.eup %1372 }
 0x8f3   :  { %v554_v30 = vadd.f32 1.0, %v1373_v29 }
 0x8f5   :  { %1374 = vrcp.f32 %v554_v30 }
 0x902   :  { %v1375_v31 = vpop.eup %1374 }
 0x903   :  { %v558_v34 = vmul.f32 %v1375_v31, %v468_v16 }
 0x963   :  { %v561_v32 = vpop.permute.xlu0 %560 }
 0x964   :  { %v563_v33 = vmul.f32 %v1375_v31, %v561_v32 }
 0x966   :  { %565 = vrot.lane.b32.xlu1 %v563_v33, %s1413_s3 }
 0x9d8   :  { %v566_v35 = vpop.permute.xlu1 %565 }
 0x9d9   :  { %v568_v37 = vadd.f32 %v566_v35, %v558_v34 }
 0x9db   :  { %1376 = vtanh.f32 %v568_v37 }
 0x9e8   :  { %v1377_v38 = vpop.eup %1376 }
 0x9e9   :  { %571 = vrot.lane.b32.xlu0 %v1377_v38, %s1412_s27 }
 0xa5b   :  { %v572_v39 = vpop.permute.xlu0 %571 }
 0xa5c   :  { %v574_v40 = vmul.f32 %v1375_v31, %v572_v39 }
 0xa5e   :  { %576 = vrot.lane.b32.xlu1 %v574_v40, %s1413_s3 }
 0xad0   :  { %v1623_v41 = vpop.permute.xlu1 %576 }
 0xad1   :  { %1284 = vmatmul.mubr.msk.f32.vlgmr.msra.gmra.mxu0 %vm176_vm2, %v1623_v41 }
 0xad2   :  { %1298 = vmatpush3.msra.mxu0 %v1473_v3  ;;  %1305 = vmatprep.mubr.msk.f32.mxu0 %vm1411_vm1, %v1410_v5 }
 0xad3   :  { %1299 = vmatprep.subr.mxu0 %v1410_v5 }
 0xad4   :  { %1300 = vmatpush3.msra.mxu0 %v1490_v8 }
 0xad5   :  { %1301 = vmatprep.subr.mxu0 %v1410_v5 }
 0xad6   :  { %1302 = vmatpush3.msra.mxu0 %v1502_v10 }
 0xad7   :  { %1303 = vmatprep.subr.mxu0 %v1410_v5 }
 0xad8   :  { %1304 = vmatpush3.msra.mxu0 %v1511_v11 }
 0xad9   :  { %1319 = vmatprep.subr.mxu0 %v988_v6 }
 0xb91   :  { %v646_v43 = vpop.f32.mrf.mxu0 }
 0xb92   :  { %v650_v44 = vadd.f32 %v646_v43, %v154_v42 }
 0xb93   :  { %v1285_v45 = vpop.f32.mrf.mxu0 }
 0xb94   :  { %1378 = vtanh.f32 %v650_v44  ;;  %v1140_v47 = vmul.f32 -1.442695, %v650_v44 }
 0xb96   :  { %1380 = vpow2.f32 %v1140_v47 }
 0xba1   :  { %v1379_v46 = vpop.eup %1378 }
 0xba2   :  { %660 = vrot.lane.b32.xlu0 %v1379_v46, %s1412_s27 }
 0xba3   :  { %v1381_v48 = vpop.eup %1380 }
 0xba4   :  { %v654_v49 = vadd.f32 1.0, %v1381_v48 }
 0xba6   :  { %1382 = vrcp.f32 %v654_v49 }
 0xbb3   :  { %v1383_v50 = vpop.eup %1382 }
 0xbb4   :  { %v658_v53 = vmul.f32 %v1383_v50, %v568_v37 }
 0xc14   :  { %v661_v51 = vpop.permute.xlu0 %660 }
 0xc15   :  { %v663_v52 = vmul.f32 %v1383_v50, %v661_v51  ;;  %v169_v51 = vadd.f32 %v1542_v15, %v1547_v17 }
 0xc17   :  { %665 = vrot.lane.b32.xlu1 %v663_v52, %s1413_s3 }
 0xc89   :  { %v666_v54 = vpop.permute.xlu1 %665 }
 0xc8a   :  { %v668_v13 = vadd.f32 %v666_v54, %v658_v53 }
 0xc8c   :  { %1384 = vtanh.f32 %v668_v13 }
 0xc99   :  { %v1385_v55 = vpop.eup %1384 }
 0xc9a   :  { %671 = vrot.lane.b32.xlu0 %v1385_v55, %s1412_s27 }
 0xd0c   :  { %v672_v57 = vpop.permute.xlu0 %671 }
 0xd0d   :  { %v674_v58 = vmul.f32 %v1383_v50, %v672_v57 }
 0xd0f   :  { %676 = vrot.lane.b32.xlu1 %v674_v58, %s1413_s3 }
 0xd81   :  { %v677_v59 = vpop.permute.xlu1 %676 }
 0xd82   :  { %1295 = vmatmul.mubr.msk.f32.vlgmr.msra.gmra.mxu1 %vm176_vm2, %v677_v59 }
 0xd83   :  { %1309 = vmatpush3.msra.mxu1 %v1473_v3  ;;  %1316 = vmatprep.mubr.msk.f32.mxu1 %vm1411_vm1, %v1410_v5 }
 0xd84   :  { %1310 = vmatprep.subr.mxu1 %v1410_v5 }
 0xd85   :  { %1311 = vmatpush3.msra.mxu1 %v1490_v8 }
 0xd86   :  { %1312 = vmatprep.subr.mxu1 %v1410_v5 }
 0xd87   :  { %1313 = vmatpush3.msra.mxu1 %v1502_v10 }
 0xd88   :  { %1314 = vmatprep.subr.mxu1 %v1410_v5 }
 0xd89   :  { %1315 = vmatpush3.msra.mxu1 %v1511_v11 }
 0xe42   :  { %v746_v61 = vpop.f32.mrf.mxu1 }
 0xe43   :  { %v750_v3 = vadd.f32 %v746_v61, %v159_v60 }
 0xe44   :  { %v1296_v62 = vpop.f32.mrf.mxu1 }
 0xe45   :  { %1386 = vtanh.f32 %v750_v3  ;;  %v1142_v0 = vmul.f32 -1.442695, %v750_v3 }
 0xe47   :  { %1388 = vpow2.f32 %v1142_v0 }
 0xe52   :  { %v1387_v63 = vpop.eup %1386 }
 0xe53   :  { %760 = vrot.lane.b32.xlu0 %v1387_v63, %s1412_s27 }
 0xe54   :  { %v1389_v8 = vpop.eup %1388 }
 0xe55   :  { %v754_v1 = vadd.f32 1.0, %v1389_v8 }
 0xe57   :  { %1390 = vrcp.f32 %v754_v1 }
 0xe64   :  { %v1391_v10 = vpop.eup %1390 }
 0xe65   :  { %v758_v11 = vmul.f32 %v1391_v10, %v668_v13 }
 0xec5   :  { %v761_v2 = vpop.permute.xlu0 %760 }
 0xec6   :  { %v763_v5 = vmul.f32 %v1391_v10, %v761_v2 }
 0xec8   :  { %765 = vrot.lane.b32.xlu1 %v763_v5, %s1413_s3 }
 0xf3a   :  { %v766_v4 = vpop.permute.xlu1 %765 }
 0xf3b   :  { %v1656_v12 = vadd.f32 %v766_v4, %v758_v11 }
 0xf3d   :  { %1392 = vtanh.f32 %v1656_v12 }
 0xf4a   :  { %v1393_v7 = vpop.eup %1392 }
 0xf4b   :  { %771 = vrot.lane.b32.xlu0 %v1393_v7, %s1412_s27 }
 0xfbd   :  { %v772_v9 = vpop.permute.xlu0 %771 }
 0xfbe   :  { %v774_v14 = vmul.f32 %v1391_v10, %v772_v9 }
 0xfc0   :  { %776 = vrot.lane.b32.xlu1 %v774_v14, %s1413_s3 }
0x1032   :  { %v777_v16 = vpop.permute.xlu1 %776 }
0x1033   :  { %1306 = vmatmul.mubr.msk.f32.vlgmr.msra.gmra.mxu0 %vm176_vm2, %v777_v16 }
0x1034   :  { %1320 = vmatpush3.msra.mxu0 %v988_v6  ;;  %1327 = vmatprep.mubr.msk.f32.mxu0 %vm176_vm2, %v1556_v36  ;;  %v164_v36 = vadd.f32 %v1547_v17, %v1549_v18 }
0x1035   :  { %1321 = vmatprep.subr.mxu0 %v987_v19 }
0x1036   :  { %1322 = vmatpush3.msra.mxu0 %v987_v19 }
0x1037   :  { %1323 = vmatprep.subr.mxu0 %v986_v20 }
0x1038   :  { %1324 = vmatpush3.msra.mxu0 %v986_v20 }
0x1039   :  { %1325 = vmatprep.subr.mxu0 %v985_v21 }
0x103a   :  { %1326 = vmatpush3.msra.mxu0 %v985_v21 }
0x103b   :  { %1328 = vmatmul.mubr.msk.f32.vlgmr.msra.gmra.mxu0 %vm176_vm2, %v1585_v56  ;;  %v1689_v56 = vld [vmem:[%s1750_s5] ss:$0 sm:$0xff] }
0x103c   :  { %1330 = vmatprep.mubr.msk.f32.mxu0 %vm176_vm2, %v1604_v22 }
0x103f   :  { %1331 = vmatmul.mubr.msk.f32.gmra.mxu0 %vm176_vm2, %v1623_v41 }
0x1040   :  { %1333 = vmatprep.mubr.msk.f32.mxu0 %vm176_vm2, %v677_v59 }
0x1043   :  { %1334 = vmatmul.mubr.msk.f32.gmra.mxu0 %vm176_vm2, %v777_v16 }
0x10f3   :  { %v846_v23 = vpop.f32.mrf.mxu0 }
0x10f4   :  { %v850_v24 = vadd.f32 %v846_v23, %v164_v36 }
0x10f5   :  { %v1307_v25 = vpop.f32.mrf.mxu0 }
0x10f6   :  { %1394 = vtanh.f32 %v850_v24  ;;  %v1144_v38 = vmul.f32 -1.442695, %v850_v24 }
0x10f8   :  { %1396 = vpow2.f32 %v1144_v38 }
0x10fb   :  { %v1329_v22 = vpop.f32.mrf.mxu0 }
0x10fc   :  { %v1070_v26 = vadd.f32 %v1329_v22, %v1689_v56 }
0x10fd   :  { %v1064_v27 = vpop.f32.mrf.mxu0 }
0x10fe   :  { %1104 = vst [vmem:[%s1751_s6 + $0x8] sm:$0xff] %v1070_v26  ;;  %v1065_v28 = vadd.f32 %v1689_v56, %v1064_v27 }
0x10ff   :  { %v1332_v18 = vpop.f32.mrf.mxu0 }
0x1100   :  { %1103 = vst [vmem:[%s1751_s6] sm:$0xff] %v1065_v28  ;;  %v1080_v29 = vadd.f32 %v1332_v18, %v1689_v56 }
0x1101   :  { %v1074_v30 = vpop.f32.mrf.mxu0 }
0x1102   :  { %1106 = vst [vmem:[%s1751_s6 + $0x18] sm:$0xff] %v1080_v29  ;;  %v1075_v31 = vadd.f32 %v1689_v56, %v1074_v30 }
0x1103   :  { %v1395_v32 = vpop.eup %1394  ;;  %v1335_v33 = vpop.f32.mrf.mxu0 }
0x1104   :  { %1105 = vst [vmem:[%s1751_s6 + $0x10] sm:$0xff] %v1075_v31  ;;  %v1090_v34 = vadd.f32 %v1335_v33, %v1689_v56  ;;  %860 = vrot.lane.b32.xlu0 %v1395_v32, %s1412_s27 }
0x1105   :  { %v1084_v35 = vpop.f32.mrf.mxu0  ;;  %v1397_v39 = vpop.eup %1396 }
0x1106   :  { %1108 = vst [vmem:[%s1751_s6 + $0x28] sm:$0xff] %v1090_v34  ;;  %v1085_v37 = vadd.f32 %v1689_v56, %v1084_v35  ;;  %v854_v40 = vadd.f32 1.0, %v1397_v39 }
0x1108   :  { %1107 = vst [vmem:[%s1751_s6 + $0x20] sm:$0xff] %v1085_v37  ;;  %1398 = vrcp.f32 %v854_v40 }
0x1115   :  { %v1399_v41 = vpop.eup %1398 }
0x1116   :  { %v858_v44 = vmul.f32 %v1399_v41, %v1656_v12 }
0x1176   :  { %v861_v42 = vpop.permute.xlu0 %860 }
0x1177   :  { %v863_v43 = vmul.f32 %v1399_v41, %v861_v42 }
0x1179   :  { %865 = vrot.lane.b32.xlu1 %v863_v43, %s1413_s3 }
0x11eb   :  { %v866_v45 = vpop.permute.xlu1 %865 }
0x11ec   :  { %v868_v46 = vadd.f32 %v866_v45, %v858_v44 }
0x11ee   :  { %1400 = vtanh.f32 %v868_v46 }
0x11fb   :  { %v1401_v47 = vpop.eup %1400 }
0x11fc   :  { %871 = vrot.lane.b32.xlu0 %v1401_v47, %s1412_s27 }
0x126e   :  { %v872_v48 = vpop.permute.xlu0 %871 }
0x126f   :  { %v874_v49 = vmul.f32 %v1399_v41, %v872_v48 }
0x1271   :  { %876 = vrot.lane.b32.xlu1 %v874_v49, %s1413_s3 }
0x12e3   :  { %v877_v50 = vpop.permute.xlu1 %876 }
0x12e4   :  { %1317 = vmatmul.mubr.msk.f32.vlgmr.msra.gmra.mxu1 %vm176_vm2, %v877_v50  ;;  %1336 = vmatprep.mubr.msk.f32.mxu0 %vm176_vm2, %v877_v50 }
0x13a4   :  { %v946_v52 = vpop.f32.mrf.mxu1 }
0x13a5   :  { %v950_v53 = vadd.f32 %v946_v52, %v169_v51 }
0x13a6   :  { %v1318_v54 = vpop.f32.mrf.mxu1 }
0x13a7   :  { %1402 = vtanh.f32 %v950_v53  ;;  %v1146_v55 = vmul.f32 -1.442695, %v950_v53 }
0x13a9   :  { %1404 = vpow2.f32 %v1146_v55 }
0x13b4   :  { %v1403_v13 = vpop.eup %1402 }
0x13b5   :  { %960 = vrot.lane.b32.xlu0 %v1403_v13, %s1412_s27 }
0x13b6   :  { %v1405_v57 = vpop.eup %1404 }
0x13b7   :  { %v954_v58 = vadd.f32 1.0, %v1405_v57 }
0x13b9   :  { %1406 = vrcp.f32 %v954_v58 }
0x13c6   :  { %v1407_v59 = vpop.eup %1406 }
0x13c7   :  { %v958_v3 = vmul.f32 %v1407_v59, %v868_v46 }
0x1427   :  { %v961_v60 = vpop.permute.xlu0 %960 }
0x1428   :  { %v963_v61 = vmul.f32 %v1407_v59, %v961_v60 }
0x142a   :  { %965 = vrot.lane.b32.xlu1 %v963_v61, %s1413_s3 }
0x149c   :  { %v966_v62 = vpop.permute.xlu1 %965 }
0x149d   :  { %v968_v15 = vadd.f32 %v966_v62, %v958_v3 }
0x149f   :  { %1408 = vtanh.f32 %v968_v15 }
0x14ac   :  { %v1409_v17 = vpop.eup %1408 }
0x14ad   :  { %971 = vrot.lane.b32.xlu0 %v1409_v17, %s1412_s27 }
0x14b1   :  { %981 = vrot.lane.b32.xlu0 %v968_v15, %s1414_s28 }
0x151f   :  { %v972_v63 = vpop.permute.xlu0 %971 }
0x1520   :  { %v974_v0 = vmul.f32 %v1407_v59, %v972_v63 }
0x1522   :  { %976 = vrot.lane.b32.xlu1 %v974_v0, %s1413_s3 }
0x1523   :  { %v982_v8 = vpop.permute.xlu0 %981 }
0x1524   :  { %984 = vst.msk [vmem:[%s1752_s8] sm:$0xff] %vm176_vm2, %v982_v8 }
0x1594   :  { %v977_v1 = vpop.permute.xlu1 %976 }
0x1595   :  { %979 = vst.msk [vmem:[%s1753_s7] sm:$0xff] %vm176_vm2, %v977_v1  ;;  %1337 = vmatmul.mubr.msk.f32.gmra.mxu0 %vm176_vm2, %v977_v1 }
0x1655   :  { %v1338_v10 = vpop.f32.mrf.mxu0 }
0x1656   :  { %v1100_v2 = vadd.f32 %v1338_v10, %v1689_v56 }
0x1657   :  { %v1094_v5 = vpop.f32.mrf.mxu0 }
0x1658   :  { %1110 = vst [vmem:[%s1751_s6 + $0x38] sm:$0xff] %v1100_v2  ;;  %v1095_v11 = vadd.f32 %v1689_v56, %v1094_v5 }
0x165a   :  { %1109 = vst [vmem:[%s1751_s6 + $0x30] sm:$0xff] %v1095_v11 }

</bundles_post_ra>
